<compile_context>
chip_gen: v5e
topology: v5e:2x2
jax: 0.10.0
libtpu: 0.0.40
codegen_flags: <defaults>
</compile_context>

<pallas_src>
import numpy as np
import jax
import jax.numpy as jnp
from jax.experimental import pallas as pl
from jax.experimental.pallas import tpu as pltpu

# ---------------------------------------------------------------------------
# sizes (synthetic, small but consistent with SMPL: 24 joints, 10 betas)
# ---------------------------------------------------------------------------
B = 2          # batch
V = 512        # number of vertices (real SMPL: 6890) -- synthetic small mesh
J = 24         # SMPL joints
NB = 10        # shape (beta) basis
NP = 207       # pose basis = 23 * 9
N3V = 3 * V    # flattened (planar) vertex dim
TN = N3V // 2  # 768 -> exactly 2 lane-dense blend blocks (one per TC on v7x)

SMPL_PARENTS = np.array(
    [-1, 0, 0, 0, 1, 2, 3, 4, 5, 6, 7, 8, 9, 9, 9, 12, 13, 14, 16, 17, 18,
     19, 20, 21], dtype=np.int32)


# ---------------------------------------------------------------------------
# Pallas kernels
# ---------------------------------------------------------------------------
def blend_kernel(betas_ref, pose_ref, sd_ref, pd_ref, vt_ref,
                 vshaped_ref, vposed_ref):
    # betas_ref: (B, 10)  bf16    sd_ref: (10, TN) bf16
    # pose_ref : (B, 207) bf16    pd_ref: (207, TN) bf16
    # vt_ref   : (1, TN)  f32     outputs: (B, TN) f32
    vs = vt_ref[...] + jnp.dot(betas_ref[...], sd_ref[...],
                               preferred_element_type=jnp.float32)
    vshaped_ref[...] = vs
    vposed_ref[...] = vs + jnp.dot(pose_ref[...], pd_ref[...],
                                   preferred_element_type=jnp.float32)


def skin_kernel(a_ref, w_ref, vp_ref, o_ref):
    # a_ref : (1, 16, 24) f32, rows ordered e = 4*coef + out_row, i.e.
    #         a[e, j] = rel_transform[j, out_row, coef]
    # w_ref : (24, V) bf16  (lbs weights, transposed so V is the lane dim)
    # vp_ref/o_ref: (1, 3, V) f32 planar vertices (rows x, y, z)
    A_t = a_ref[0]                                   # (16, 24)
    Wt = w_ref[...].astype(jnp.float32)              # (24, V)
    # Transposed GEMM: lane dimension is V (dense), not 16.
    Tt = jnp.dot(A_t, Wt, preferred_element_type=jnp.float32)   # (16, V)
    v = vp_ref[0]                                    # (3, V)
    x = v[0:1, :]
    y = v[1:2, :]
    z = v[2:3, :]
    # rows 0:3  -> x coefficients of output rows 0..2
    # rows 4:7  -> y coefficients, 8:11 -> z coefficients, 12:15 -> translation
    o_ref[0] = (Tt[0:3, :] * x + Tt[4:7, :] * y
                + Tt[8:11, :] * z + Tt[12:15, :])


# ---------------------------------------------------------------------------
# pallas_call wrappers
# ---------------------------------------------------------------------------
def blend_shapes_pallas(betas16, pose16, sd16, pd16, vt_flat):
    grid = (N3V // TN,)   # = (2,)
    return pl.pallas_call(
        blend_kernel,
        out_shape=(jax.ShapeDtypeStruct((B, N3V), jnp.float32),
                   jax.ShapeDtypeStruct((B, N3V), jnp.float32)),
        grid=grid,
        in_specs=[
            pl.BlockSpec((B, NB), lambda n: (0, 0)),
            pl.BlockSpec((B, NP), lambda n: (0, 0)),
            pl.BlockSpec((NB, TN), lambda n: (0, n)),
            pl.BlockSpec((NP, TN), lambda n: (0, n)),
            pl.BlockSpec((1, TN), lambda n: (0, n)),
        ],
        out_specs=[
            pl.BlockSpec((B, TN), lambda n: (0, n)),
            pl.BlockSpec((B, TN), lambda n: (0, n)),
        ],
        compiler_params=pltpu.CompilerParams(
            dimension_semantics=("parallel",)),
    )(betas16, pose16, sd16, pd16, vt_flat)


def skinning_pallas(a_t, w_t, v_posed_planar):
    # grid = (B,) = (2,): whole mesh per step (lane-dense), one block per TC
    # on v7x; w_t is small enough that the per-step re-fetch is negligible.
    return pl.pallas_call(
        skin_kernel,
        out_shape=jax.ShapeDtypeStruct((B, 3, V), jnp.float32),
        grid=(B,),
        in_specs=[
            pl.BlockSpec((1, 16, J), lambda b: (b, 0, 0)),
            pl.BlockSpec((J, V), lambda b: (0, 0)),
            pl.BlockSpec((1, 3, V), lambda b: (b, 0, 0)),
        ],
        out_specs=pl.BlockSpec((1, 3, V), lambda b: (b, 0, 0)),
        compiler_params=pltpu.CompilerParams(
            dimension_semantics=("parallel",)),
    )(a_t, w_t, v_posed_planar)


# ---------------------------------------------------------------------------
# plain-JAX glue (rotations, tiny sequential kinematic chain, reference)
# ---------------------------------------------------------------------------
def rodrigues(aa):
    """axis-angle (..., 3) -> rotation matrices (..., 3, 3)."""
    angle = jnp.sqrt(jnp.sum(aa * aa, axis=-1, keepdims=True) + 1e-12)
    axis = aa / angle
    cos = jnp.cos(angle)[..., None]
    sin = jnp.sin(angle)[..., None]
    rx, ry, rz = axis[..., 0], axis[..., 1], axis[..., 2]
    zeros = jnp.zeros_like(rx)
    K = jnp.stack([zeros, -rz, ry, rz, zeros, -rx, -ry, rx, zeros],
                  axis=-1).reshape(aa.shape[:-1] + (3, 3))
    eye = jnp.eye(3, dtype=aa.dtype)
    return eye + sin * K + (1.0 - cos) * (K @ K)


def batch_rigid_transform(rot_mats, joints, parents):
    """rot_mats (B, J, 3, 3), joints (B, J, 3) -> posed joints, rel transforms."""
    b, nj = joints.shape[:2]
    rel_joints = joints.at[:, 1:].set(joints[:, 1:] - joints[:, parents[1:]])
    tm = jnp.concatenate([rot_mats, rel_joints[..., None]], axis=-1)  # (B,J,3,4)
    bottom = jnp.concatenate(
        [jnp.zeros((b, nj, 1, 3), jnp.float32),
         jnp.ones((b, nj, 1, 1), jnp.float32)], axis=-1)
    tm = jnp.concatenate([tm, bottom], axis=-2)                       # (B,J,4,4)

    chain = [tm[:, 0]]
    for i in range(1, nj):
        chain.append(chain[int(parents[i])] @ tm[:, i])
    transforms = jnp.stack(chain, axis=1)                             # (B,J,4,4)

    posed_joints = transforms[:, :, :3, 3]
    joints_hom = jnp.concatenate(
        [joints, jnp.zeros((b, nj, 1), jnp.float32)], axis=-1)[..., None]
    init_bone = transforms @ joints_hom                               # (B,J,4,1)
    init_bone = jnp.pad(init_bone, ((0, 0), (0, 0), (0, 0), (3, 0)))
    rel_transforms = transforms - init_bone
    return posed_joints, rel_transforms


def smpl_forward(betas, thetas, params):
    """Equivalent of SMPL.forward(betas, thetas, is_rotmat=True,
    gender='neutral', joint_type='SMPL_24'). Returns (vertices, joints)."""
    sd16, pd16, vt_flat, j_regressor, w_t16, parents = params
    rot_mats = thetas                                                 # (B,24,3,3)

    pose_feature = (rot_mats[:, 1:] - jnp.eye(3, dtype=jnp.float32)
                    ).reshape(B, NP)

    v_shaped_flat, v_posed_flat = blend_shapes_pallas(
        betas.astype(jnp.bfloat16), pose_feature.astype(jnp.bfloat16),
        sd16, pd16, vt_flat)
    v_shaped_p = v_shaped_flat.reshape(B, 3, V)                       # planar
    v_posed_p = v_posed_flat.reshape(B, 3, V)

    # Joint regression: ~74 KFLOPs -> plain JAX (avoids an N=3 masked-output
    # pallas_call and an extra HBM round-trip of v_shaped).
    j_shaped = jnp.einsum('jv,bcv->bjc', j_regressor, v_shaped_p)     # (B,24,3)

    posed_joints, rel_transforms = batch_rigid_transform(
        rot_mats, j_shaped, parents)

    # a_t[b, 4*coef + row, j] = rel_transforms[b, j, row, coef]
    a_t = jnp.transpose(rel_transforms, (0, 3, 2, 1)).reshape(B, 16, J)

    verts_p = skinning_pallas(a_t, w_t16, v_posed_p)                  # (B,3,V)
    verts = jnp.transpose(verts_p, (0, 2, 1))                         # (B,V,3)

    # joint_type == 'SMPL_24': first 24 joints are the LBS-posed joints
    joints = posed_joints[:, 0:24, :]
    return verts, joints


def smpl_forward_reference(betas, thetas, params):
    """Pure-JAX reference (uses the same bf16-quantized constant matrices)."""
    sd16, pd16, vt_flat, j_regressor, w_t16, parents = params
    sd = sd16.astype(jnp.float32)
    pd = pd16.astype(jnp.float32)
    w = w_t16.astype(jnp.float32).T                                   # (V, J)

    rot_mats = thetas
    pose_feature = (rot_mats[:, 1:] - jnp.eye(3, dtype=jnp.float32)
                    ).reshape(B, NP)
    b16 = betas.astype(jnp.bfloat16).astype(jnp.float32)
    p16 = pose_feature.astype(jnp.bfloat16).astype(jnp.float32)

    v_shaped_p = (vt_flat + b16 @ sd).reshape(B, 3, V)
    v_posed_p = v_shaped_p + (p16 @ pd).reshape(B, 3, V)
    v_shaped = jnp.transpose(v_shaped_p, (0, 2, 1))                   # (B,V,3)
    v_posed = jnp.transpose(v_posed_p, (0, 2, 1))

    j_shaped = jnp.einsum('jv,bvk->bjk', j_regressor, v_shaped)
    posed_joints, rel_transforms = batch_rigid_transform(
        rot_mats, j_shaped, parents)
    t_full = jnp.einsum('vj,bjk->bvk', w,
                        rel_transforms.reshape(B, J, 16)).reshape(B, V, 4, 4)
    vh = jnp.concatenate([v_posed, jnp.ones((B, V, 1), jnp.float32)], axis=-1)
    verts = jnp.einsum('bvij,bvj->bvi', t_full, vh)[..., :3]
    return verts, posed_joints[:, 0:24, :]


# ---------------------------------------------------------------------------
# main
# ---------------------------------------------------------------------------
if __name__ == "__main__":
    key = jax.random.PRNGKey(0)
    k = jax.random.split(key, 8)

    # deterministic synthetic SMPL parameters (shapes per smplx convention)
    v_template = (jax.random.normal(k[0], (V, 3)) * 0.1).astype(jnp.float32)
    shapedirs = (jax.random.normal(k[1], (V, 3, NB)) * 0.01).astype(jnp.float32)
    posedirs = (jax.random.normal(k[2], (NP, V, 3)) * 0.001).astype(jnp.float32)
    jr_raw = jax.random.uniform(k[3], (J, V), dtype=jnp.float32)
    j_regressor = jr_raw / jr_raw.sum(axis=1, keepdims=True)
    w_raw = jax.random.uniform(k[4], (V, J), dtype=jnp.float32)
    lbs_weights = w_raw / w_raw.sum(axis=1, keepdims=True)

    # planar (all x | all y | all z) lane-dense layout; big matrices -> bf16
    sd_planar = jnp.transpose(shapedirs, (2, 1, 0)).reshape(NB, N3V) \
                   .astype(jnp.bfloat16)                              # (10, 3V)
    pd_planar = jnp.transpose(posedirs, (0, 2, 1)).reshape(NP, N3V) \
                   .astype(jnp.bfloat16)                              # (207, 3V)
    vt_planar = jnp.transpose(v_template, (1, 0)).reshape(1, N3V)     # f32
    w_t = jnp.transpose(lbs_weights, (1, 0)).astype(jnp.bfloat16)     # (24, V)

    params = (sd_planar, pd_planar, vt_planar, j_regressor, w_t, SMPL_PARENTS)

    # inputs: betas (B, 10), thetas (B, 24, 3, 3) rotation matrices
    betas = (jax.random.normal(k[5], (B, NB)) * 0.5).astype(jnp.float32)
    axis_angle = (jax.random.normal(k[6], (B, J, 3)) * 0.3).astype(jnp.float32)
    thetas = rodrigues(axis_angle).astype(jnp.float32)

    verts, joints = smpl_forward(betas, thetas, params)
    verts = jax.block_until_ready(verts)
    joints = jax.block_until_ready(joints)

    assert verts.shape == (B, V, 3) and verts.dtype == jnp.float32
    assert joints.shape == (B, 24, 3) and joints.dtype == jnp.float32

    verts_ref, joints_ref = smpl_forward_reference(betas, thetas, params)
    np.testing.assert_allclose(np.asarray(verts), np.asarray(verts_ref),
                               rtol=1e-3, atol=1e-4)
    np.testing.assert_allclose(np.asarray(joints), np.asarray(joints_ref),
                               rtol=1e-3, atol=1e-4)

    print("KERNEL_OK")
</pallas_src>

<mosaic_0001>
module attributes {stable_mosaic.version = 11 : i64} {
  func.func @blend_kernel(%arg0: i32, %arg1: memref<2x10xbf16, #tpu.memory_space<vmem>>, %arg2: memref<2x207xbf16, #tpu.memory_space<vmem>>, %arg3: memref<10x768xbf16, #tpu.memory_space<vmem>>, %arg4: memref<207x768xbf16, #tpu.memory_space<vmem>>, %arg5: memref<1x768xf32, #tpu.memory_space<vmem>>, %arg6: memref<2x768xf32, #tpu.memory_space<vmem>>, %arg7: memref<2x768xf32, #tpu.memory_space<vmem>>) attributes {dimension_semantics = [#tpu.dimension_semantics<parallel>], iteration_bounds = array<i64: 2>, scalar_prefetch = 0 : i64, scratch_operands = 0 : i64, tpu.core_type = #tpu.core_type<tc>, window_params = [{pipeline_mode = #tpu.pipeline_mode<synchronous>, transform_indices = @transform_0, window_bounds = array<i64: 2, 10>}, {pipeline_mode = #tpu.pipeline_mode<synchronous>, transform_indices = @transform_1, window_bounds = array<i64: 2, 207>}, {transform_indices = @transform_2, window_bounds = array<i64: 10, 768>}, {transform_indices = @transform_3, window_bounds = array<i64: 207, 768>}, {transform_indices = @transform_4, window_bounds = array<i64: 1, 768>}, {transform_indices = @transform_5, window_bounds = array<i64: 2, 768>}, {transform_indices = @transform_6, window_bounds = array<i64: 2, 768>}]} {
    %c0 = arith.constant 0 : index
    %c0_0 = arith.constant 0 : index
    %0 = vector.load %arg5[%c0, %c0_0] : memref<1x768xf32, #tpu.memory_space<vmem>>, vector<1x768xf32>
    %c0_1 = arith.constant 0 : index
    %c0_2 = arith.constant 0 : index
    %1 = vector.load %arg1[%c0_1, %c0_2] : memref<2x10xbf16, #tpu.memory_space<vmem>>, vector<2x10xbf16>
    %c0_3 = arith.constant 0 : index
    %c0_4 = arith.constant 0 : index
    %2 = vector.load %arg3[%c0_3, %c0_4] : memref<10x768xbf16, #tpu.memory_space<vmem>>, vector<10x768xbf16>
    %cst = arith.constant dense<0.000000e+00> : vector<2x768xf32>
    %3 = tpu.matmul %1, %2, %cst {dimension_numbers = #tpu.dot_dimension_numbers<[1], [0], [0], [1], [0, 0, 1, 1], [], []>} : vector<2x10xbf16>, vector<10x768xbf16>, vector<2x768xf32> -> vector<2x768xf32>
    %4 = vector.broadcast %0 : vector<1x768xf32> to vector<2x768xf32>
    %5 = arith.addf %4, %3 : vector<2x768xf32>
    %c0_5 = arith.constant 0 : index
    %c0_6 = arith.constant 0 : index
    %6 = vector.load %arg6[%c0_5, %c0_6] : memref<2x768xf32, #tpu.memory_space<vmem>>, vector<2x768xf32>
    tpu.vector_store %arg6[%c0_5, %c0_6], %5 {strides = array<i32>} : memref<2x768xf32, #tpu.memory_space<vmem>>, vector<2x768xf32>,
    %c0_7 = arith.constant 0 : index
    %c0_8 = arith.constant 0 : index
    %7 = vector.load %arg2[%c0_7, %c0_8] : memref<2x207xbf16, #tpu.memory_space<vmem>>, vector<2x207xbf16>
    %c0_9 = arith.constant 0 : index
    %c0_10 = arith.constant 0 : index
    %8 = vector.load %arg4[%c0_9, %c0_10] : memref<207x768xbf16, #tpu.memory_space<vmem>>, vector<207x768xbf16>
    %cst_11 = arith.constant dense<0.000000e+00> : vector<2x768xf32>
    %9 = tpu.matmul %7, %8, %cst_11 {dimension_numbers = #tpu.dot_dimension_numbers<[1], [0], [0], [1], [0, 0, 1, 1], [], []>} : vector<2x207xbf16>, vector<207x768xbf16>, vector<2x768xf32> -> vector<2x768xf32>
    %10 = arith.addf %5, %9 : vector<2x768xf32>
    %c0_12 = arith.constant 0 : index
    %c0_13 = arith.constant 0 : index
    %11 = vector.load %arg7[%c0_12, %c0_13] : memref<2x768xf32, #tpu.memory_space<vmem>>, vector<2x768xf32>
    tpu.vector_store %arg7[%c0_12, %c0_13], %10 {strides = array<i32>} : memref<2x768xf32, #tpu.memory_space<vmem>>, vector<2x768xf32>,
    return
  }
  func.func @transform_0(%arg0: i32) -> (i32, i32) {
    %c0_i32 = arith.constant 0 : i32
    %c0_i32_0 = arith.constant 0 : i32
    %c0_i32_1 = arith.constant 0 : i32
    return %c0_i32, %c0_i32_0 : i32, i32
  }
  func.func @transform_1(%arg0: i32) -> (i32, i32) {
    %c0_i32 = arith.constant 0 : i32
    %c0_i32_0 = arith.constant 0 : i32
    %c0_i32_1 = arith.constant 0 : i32
    return %c0_i32, %c0_i32_0 : i32, i32
  }
  func.func @transform_2(%arg0: i32) -> (i32, i32) {
    %c0_i32 = arith.constant 0 : i32
    %c0_i32_0 = arith.constant 0 : i32
    return %c0_i32, %arg0 : i32, i32
  }
  func.func @transform_3(%arg0: i32) -> (i32, i32) {
    %c0_i32 = arith.constant 0 : i32
    %c0_i32_0 = arith.constant 0 : i32
    return %c0_i32, %arg0 : i32, i32
  }
  func.func @transform_4(%arg0: i32) -> (i32, i32) {
    %c0_i32 = arith.constant 0 : i32
    %c0_i32_0 = arith.constant 0 : i32
    return %c0_i32, %arg0 : i32, i32
  }
  func.func @transform_5(%arg0: i32) -> (i32, i32) {
    %c0_i32 = arith.constant 0 : i32
    %c0_i32_0 = arith.constant 0 : i32
    return %c0_i32, %arg0 : i32, i32
  }
  func.func @transform_6(%arg0: i32) -> (i32, i32) {
    %c0_i32 = arith.constant 0 : i32
    %c0_i32_0 = arith.constant 0 : i32
    return %c0_i32, %arg0 : i32, i32
  }
}

</mosaic_0001>

<bundles_post_ra>
// kernel: tpu_custom_call.1
= control target key start
LH: loop header
LB: loop body
LE: loop exit
PB: predicated region body
PF: predicated region fallthrough
CT: control target
= control target key end

     0   :  { %s2748_s0 = inlined_call_operand.hbm [shape: bf16[2,10], index: 0, kind: input, shape index: {}]   ;;  %s2749_s1 = inlined_call_operand.hbm [shape: bf16[2,207], index: 1, kind: input, shape index: {}]   ;;  %s2750_s2 = inlined_call_operand.hbm [shape: bf16[10,1536], index: 2, kind: input, shape index: {}]   ;;  %s2751_s3 = inlined_call_operand.hbm [shape: bf16[207,1536], index: 3, kind: input, shape index: {}]   ;;  %s2752_s4 = inlined_call_operand.hbm [shape: f32[1,1536], index: 4, kind: input, shape index: {}]   ;;  %s2753_s5 = inlined_call_operand.hbm [shape: f32[2,1536], index: 5, kind: output, shape index: {0}]   ;;  %s2754_s6 = inlined_call_operand.hbm [shape: f32[2,1536], index: 6, kind: output, shape index: {1}]  }
   0x1   :  { %2765 = sst [smem:[#allocation24_spill]] %s2748_s0 }
   0x2   :  { %2766 = sst [smem:[#allocation25_spill]] %s2750_s2 }
   0x3   :  { %2767 = sst [smem:[#allocation26_spill]] %s2754_s6 }
   0x4   :  { %12 = vsyncpa [#allocation3], 0 }
   0x5   :  { %13 = vsyncpa [#allocation6], 0 }
   0x6   :  { %14 = vsyncpa [#allocation4], 0 }
   0x7   :  { %16 = vsyncpa [#allocation4 + $0x1], 0 }
   0x8   :  { %17 = vsyncpa [#allocation12], 0 }
   0x9   :  { %19 = vsyncpa [#allocation12 + $0x1], 0  ;;  %s2278_s21 = smov 0   ;;  %s2280_s22 = smov 0  }
   0xa   :  { %s2282_s23 = smov 0   ;;  %s2284_s24 = smov 0  }
   0xb LB: > { %2768 = sst [smem:[#allocation18_spill]] %s2223_s21  ;;  %s2299_s25 = sadd.s32 4294967295, %s2235_s24   ;;  %s2235_s24 = sphi %s2284_s24, %s2793_s24   ;;  %s2231_s23 = sphi %s2282_s23, %s2795_s23   ;;  %s2227_s22 = sphi %s2280_s22, %s2797_s22   ;;  %s2223_s21 = sphi %s2278_s21, %s2796_s21  }
   0xc   : > { %2769 = sst [smem:[#allocation19_spill]] %s2231_s23  ;;  %s1436_s26 = sadd.s32 4294967294, %s2235_s24  }
   0xd   : > { %s2303_s27 = sadd.s32 1, %s2235_s24   ;;  %s74_s28 = sadd.s32 1, %s2231_s23 }
   0xe   : > { %2770 = sst [smem:[#allocation20_spill]] %s2303_s27  ;;  %s71_s29 = ssub.s32 %s2235_s24, %s2303_s27 }
   0xf   : > { %p81_p0 = scmp.ne.s32.totalorder %s2231_s23, %s2227_s22  ;;  %p72_p1 = scmp.eq.s32.totalorder %s71_s29, 0 }
  0x10   : > { %p82_p2 = scmp.eq.s32.totalorder %s2235_s24, 0  ;;  %p87_p3 = scmp.ne.s32.totalorder %s2227_s22, %s2223_s21 }
  0x11   : > { %p2756_p4 = scmp.eq.s32.totalorder %s2299_s25, 0  ;;  %p163_p7 = scmp.eq.s32.totalorder %s2299_s25, 1 }
  0x12   : > { %s2315_s30 = scalar_select %p72_p1, %s2231_s23, %s74_s28  }
  0x13   : > { %p2317_p5 = por %p82_p2, %p81_p0  ;;  %p2323_p6 = por %p2756_p4, %p87_p3 }
  0x14   : > { %2771 = sst [smem:[#allocation21_spill]] %s2315_s30  ;;  %p169_p8 = scmp.eq.s32.totalorder %s1436_s26, 1 }
  0x15   : > { %p1437_p9 = scmp.ge.s32.totalorder %s2235_s24, 1  ;;  %p202_p10 = scmp.lt.s32.totalorder %s2235_s24, 3 }
  0x16   : > { %p2330_p11 = por %p163_p7, %p81_p0  ;;  %p2334_p12 = por %p169_p8, %p87_p3 }
  0x17   : > { %p2338_p13 = pnand %p1437_p9, %p202_p10  ;;  %s2779_s0 = sld [smem:[#allocation24_spill]] }
  0x18   : > { %s2774_s9 = scalar_select %p2330_p11, 1, 0 }
  0x19   : > { %s2776_s10 = scalar_select %p2334_p12, 1, 0 }
  0x1a   : > { %2775 = sst [smem:[#allocation22_spill]] %s2774_s9  ;;  %p1911_p0 = pneg %p2338_p13 }
  0x1b   : > { %2777 = sst [smem:[#allocation23_spill]] %s2776_s10  ;;  %s2237_s15 = smov [#allocation2]  }
  0x1c   : > { %s216_s16 = sshll.u32 %s2237_s15, 4  ;;  %p2350_p2 = pnand %p1911_p0, %p2756_p4  ;;  %s217_s16 = int_to_ptr.vmem [resolvable:$true] %s216_s16 }
  0x1d   : > { %s214_s14 = sshll.u32 %s2779_s0, 4  ;;  %p1937_p3 = scmp.lt.s32.totalorder %s2235_s24, 2  ;;  %s215_s14 = int_to_ptr.hbm [resolvable:$true] %s214_s14 }
  0x1e   : > { %s239_s18 = sand.u32 1, %s2235_s24   ;;  %s2365_s20 = sand.u32 1, %s2231_s23  }
  0x1f   : > { %1914 = dma.hbm_to_vmem [thread:$0]  (!%p2350_p2), %s215_s14, 16, %s217_s16, [#allocation3]  }
  0x20   : > { %p2360_p7 = pnand %p1937_p3, %p2317_p5  ;;  %s1886_s26 = smul.u32 48, %s2365_s20 }
  0x21   : > { %s2757_s28 = smul.u32 24, %s2235_s24  ;;  %s2782_s2 = sld [smem:[#allocation25_spill]] }
  0x22   : > { %s243_s15 = scalar_lea.vmem [#allocation7], %s1886_s26  ;;  %s2374_s7 = scalar_lea.sflag [#allocation3], %s239_s18 }
  0x23   : > { %s251_s0 = sshll.u32 %s243_s15, 4  ;;  %p2013_p8 = pneg %p2360_p7  ;;  %s252_s0 = int_to_ptr.vmem [resolvable:$true] %s251_s0 }
  0x27   : > { %s248_s13 = scalar_lea.hbm %s2782_s2, %s2757_s28  ;;  %s2016_s26 = scalar_lea.hbm %s2782_s2, 96 }
  0x28   : > { %s249_s14 = sshll.u32 %s248_s13, 4  ;;  %s250_s14 = int_to_ptr.hbm [resolvable:$true] %s249_s14 }
  0x29   : > { %s2009_s16 = sshra.s32 %s250_s14, 4  ;;  %s2010_s16 = int_to_ptr.hbm [resolvable:$true] %s2009_s16 }
  0x2a   : > { %s2011_s30 = scalar_lea.hbm %s2010_s16, 48  ;;  %p2017_p0 = scmp.lt.s32.totalorder %s2010_s16, %s2782_s2 }
  0x2b   : > { %p2012_p5 = scmp.ne.s32.totalorder %s2010_s16, %s2011_s30  ;;  %p2018_p3 = scmp.lt.s32.totalorder %s2016_s26, %s2011_s30 }
  0x2d   : > { %p2014_p9 = pnand %p2013_p8, %p2012_p5  ;;  %p2019_p1 = por %p2018_p3, %p2017_p0 }
  0x2f   : > { %p2015_p10 = pneg %p2014_p9 }
  0x31   : > { %p2020_p4 = pnand %p2019_p1, %p2015_p10 }
  0x33   : > { %2023 = shalt.err (!%p2020_p4)
}
  0x34   : > { %s2238_s18 = smov 768   ;;  %s2239_s15 = smov 384  }
  0x35   : > { %s2240_s28 = smov 24   ;;  %s1887_s23 = smul.u32 624, %s2365_s20 }
  0x36   : > { %1921 = dma.hbm_to_vmem [thread:$0]  (!%p2360_p7), %s250_s14, 768, %s252_s0, %s2374_s7, %s2238_s18, %s2239_s15, %s2240_s28  }
  0x37   : > { %s2783_s29 = smul.u32 24, %s2235_s24  ;;  %s226_s2 = sshll.u32 %s2749_s1, 4  ;;  %s227_s2 = int_to_ptr.hbm [resolvable:$true] %s226_s2 }
  0x38   : > { %s265_s10 = scalar_lea.vmem [#allocation8], %s1887_s23  ;;  %s2046_s14 = scalar_lea.hbm %s2751_s3, 1248 }
  0x39   : > { %s270_s30 = scalar_lea.hbm %s2751_s3, %s2783_s29  ;;  %s273_s21 = sshll.u32 %s265_s10, 4  ;;  %s274_s21 = int_to_ptr.vmem [resolvable:$true] %s273_s21 }
  0x3a   : > { %s271_s16 = sshll.u32 %s270_s30, 4  ;;  %s272_s16 = int_to_ptr.hbm [resolvable:$true] %s271_s16 }
  0x3b   : > { %s2039_s6 = sshra.s32 %s272_s16, 4  ;;  %s2040_s6 = int_to_ptr.hbm [resolvable:$true] %s2039_s6 }
  0x3c   : > { %s2041_s9 = scalar_lea.hbm %s2040_s6, 624  ;;  %p2047_p9 = scmp.lt.s32.totalorder %s2040_s6, %s2751_s3 }
  0x3d   : > { %p2042_p4 = scmp.ne.s32.totalorder %s2040_s6, %s2041_s9  ;;  %p2048_p10 = scmp.lt.s32.totalorder %s2046_s14, %s2041_s9 }
  0x3f   : > { %p2044_p1 = pnand %p2042_p4, %p2013_p8  ;;  %p2049_p0 = por %p2048_p10, %p2047_p9 }
  0x41   : > { %p2045_p5 = pneg %p2044_p1 }
  0x43   : > { %p2050_p3 = pnand %p2049_p0, %p2045_p5 }
  0x45   : > { %2053 = shalt.err (!%p2050_p3)
}
  0x46   : > { %1924 = dma.hbm_to_vmem [thread:$0]  (!%p2360_p7), %s272_s16, 9984, %s274_s21, %s2374_s7, %s2238_s18, %s2239_s15, %s2240_s28  }
  0x47   : > { %s2241_s10 = smov [#allocation5]   ;;  %s1888_s30 = smul.u32 6, %s2365_s20 }
  0x48   : > { %s228_s23 = sshll.u32 %s2241_s10, 4  ;;  %s288_s26 = smul.u32 6, %s2235_s24  ;;  %s229_s23 = int_to_ptr.vmem [resolvable:$true] %s228_s23 }
  0x49   : > { %1917 = dma.hbm_to_vmem [thread:$0]  (!%p2350_p2), %s227_s2, 32, %s229_s23, [#allocation6]  }
  0x4a   : > { %s291_s13 = scalar_lea.hbm %s2752_s4, %s288_s26  ;;  %s287_s27 = scalar_lea.vmem [#allocation9], %s1888_s30 }
  0x4b   : > { %s293_s0 = sshll.u32 %s291_s13, 4  ;;  %s295_s14 = sshll.u32 %s287_s27, 4  ;;  %s294_s0 = int_to_ptr.hbm [resolvable:$true] %s293_s0  ;;  %s296_s14 = int_to_ptr.vmem [resolvable:$true] %s295_s14 }
  0x4c   : > { %s2099_s29 = sshra.s32 %s294_s0, 4  ;;  %s2106_s2 = scalar_lea.hbm %s2752_s4, 12  ;;  %s2100_s29 = int_to_ptr.hbm [resolvable:$true] %s2099_s29 }
  0x4d   : > { %s2101_s21 = scalar_lea.hbm %s2100_s29, 6  ;;  %p2107_p2 = scmp.lt.s32.totalorder %s2100_s29, %s2752_s4 }
  0x4e   : > { %p2102_p4 = scmp.ne.s32.totalorder %s2100_s29, %s2101_s21  ;;  %p2108_p9 = scmp.lt.s32.totalorder %s2106_s2, %s2101_s21 }
  0x50   : > { %p2104_p1 = pnand %p2102_p4, %p2013_p8  ;;  %p2109_p10 = por %p2108_p9, %p2107_p2 }
  0x52   : > { %p2105_p5 = pneg %p2104_p1 }
  0x54   : > { %p2110_p0 = pnand %p2109_p10, %p2105_p5 }
  0x56   : > { %2113 = shalt.err (!%p2110_p0)
}
  0x57   : > { %1927 = dma.hbm_to_vmem [thread:$0]  (!%p2360_p7), %s294_s0, 96, %s296_s14, %s2374_s7  }
  0x58   : > { %304 = sbr.rel (%p2338_p13) target bundleno = 337 (0x151), region = 40  ;;  %p2784_p8 = scmp.eq.s32.totalorder (!%p2338_p13), %s2299_s25, 0 }
  0x5d   : > { %2202 = dma.done.wait (%p2784_p8), [#allocation3], 16   ;;  %p2785_p3 = pmov %p2784_p8 }
  0x5f   : > { %2204 = vsyncadd (%p2785_p3), [#allocation3], 4294967280  ;;  %p2786_p4 = pmov %p2785_p3 }
  0x60   : > { %p2787_p1 = pmov %p2785_p3 }
  0x61   : > { %2206 = dma.done.wait (%p2786_p4), [#allocation6], 32  }
  0x62   : > { %2208 = vsyncadd (%p2787_p1), [#allocation6], 4294967264  ;;  %s316_s19 = sand.u32 1, %s2299_s25   ;;  %s2444_s7 = sand.u32 1, %s2227_s22  }
  0x63   : > { %s1889_s11 = smul.u32 48, %s2444_s7  ;;  %s317_s15 = scalar_lea.sflag [#allocation3], %s316_s19 }
  0x65   : > { %s2447_s16 = scalar_lea.vmem [#allocation7], %s1889_s11 }
  0x66   : > { %2210 = dma.done.wait (%p2323_p6), %s317_s15, 10848  }
  0x67   : > { %2212 = vsyncadd (%p2323_p6), %s317_s15, 4294956448  ;;  %s1890_s12 = smul.u32 624, %s2444_s7  ;;  %vm1035_vm0 = vcmask 1046528   ;;  %vm427_vm1 = vcmask 1044480   ;;  %vm1036_vm2 = vcmask 1047552   ;;  %v2242_v0 = vmov 65535  }
  0x68   : > { %v1037_v1 = vsel %vm1035_vm0, 4294967295, %v2242_v0  ;;  %v1448_v2 = vld [vmem:[%s2447_s16] sm:$0xf]  ;;  %v1803_v3 = vld [vmem:[%s2447_s16 + $0x14] sm:$0x10]  ;;  %vm423_vm3 = vcmask 80896  }
  0x69   : > { %v1800_v4 = vld [vmem:[%s2447_s16 + $0x4] sm:$0xf]  ;;  %v1449_v5 = vor.u32 %v1803_v3, %v1448_v2  ;;  %v1450_v6 = vld [vmem:[%s2447_s16 + $0x18] sm:$0x10]  ;;  %v1456_v7 = vld [vmem:[%s2447_s16 + $0x8] sm:$0xf] }
  0x6a   : > { %v1804_v8 = vld [vmem:[%s2447_s16 + $0x1c] sm:$0x10]  ;;  %v1453_v9 = vor.u32 %v1800_v4, %v1450_v6  ;;  %v1464_v11 = vld [vmem:[%s2447_s16 + $0x10] sm:$0xf]  ;;  %v1805_v12 = vld [vmem:[%s2447_s16 + $0x24] sm:$0x10] }
  0x6b   : > { %v1457_v10 = vor.u32 %v1804_v8, %v1456_v7  ;;  %s2462_s8 = scalar_lea.vmem [#allocation8], %s1890_s12  ;;  %v429_v14 = vsel %vm427_vm1, %v1449_v5, 0  ;;  %v1465_v15 = vor.u32 %v1805_v12, %v1464_v11  ;;  %v2471_v22 = vld [vmem:[#allocation2] sm:$0x1]  ;;  %v1458_v26 = vld [vmem:[%s2447_s16 + $0x20] sm:$0x10] }
  0x6c   : > { %v1646_v13 = vld [vmem:[%s2462_s8 + $0x150] sm:$0xf]  ;;  %v1851_v16 = vld [vmem:[%s2462_s8 + $0x164] sm:$0xf0]  ;;  %v1848_v17 = vld [vmem:[%s2462_s8 + $0x154] sm:$0xf]  ;;  %453 = vmatpush.bf16.msra.mxu3 %v429_v14 }
  0x6d   : > { %v432_v18 = vsel %vm427_vm1, %v1453_v9, 0  ;;  %v435_v19 = vsel %vm427_vm1, %v1457_v10, 0  ;;  %v1647_v20 = vor.u32 %v1851_v16, %v1646_v13  ;;  %v1648_v21 = vld [vmem:[%s2462_s8 + $0x168] sm:$0xf0]  ;;  %v441_v23 = vsel %vm427_vm1, %v1465_v15, 0  ;;  %s1891_s10 = smul.u32 6, %s2444_s7 }
  0x6e   : > { %466 = vmatpush.bf16.msra.mxu1 %v432_v18  ;;  %479 = vmatpush.bf16.msra.mxu2 %v435_v19  ;;  %v1651_v24 = vor.u32 %v1848_v17, %v1648_v21  ;;  %v1801_v25 = vld [vmem:[%s2447_s16 + $0xc] sm:$0xf]  ;;  %v2477_v27 = vsel %vm1036_vm2, %v1037_v1, 0  ;;  %v1802_v29 = vld [vmem:[%s2447_s16 + $0x14] sm:$0xf]  ;;  %vm1032_vm4 = vcmask 646144  }
  0x6f   : > { %505 = vmatpush.bf16.msra.mxu0 %v441_v23  ;;  %v1461_v28 = vor.u32 %v1801_v25, %v1458_v26  ;;  %v1466_v30 = vld [vmem:[%s2447_s16 + $0x28] sm:$0x10]  ;;  %v1766_v31 = vld [vmem:[%s2462_s8 + $0x240] sm:$0xf]  ;;  %1470 = vmatmul.msk.bf16.vlgmr.msra.gmra.mxu3 %vm423_vm3, %v2471_v22  ;;  %v1881_v33 = vld [vmem:[%s2462_s8 + $0x254] sm:$0xf0] }
  0x70   : > { %v1469_v32 = vor.u32 %v1802_v29, %v1466_v30  ;;  %v1878_v34 = vld [vmem:[%s2462_s8 + $0x244] sm:$0xf]  ;;  %v1768_v35 = vld [vmem:[%s2462_s8 + $0x258] sm:$0xf0]  ;;  %v1767_v37 = vor.u32 %v1881_v33, %v1766_v31  ;;  %v1622_v39 = vld [vmem:[%s2462_s8 + $0x120] sm:$0xf] }
  0x71   : > { %1471 = vmatmul.msk.bf16.vlgmr.msra.gmra.mxu1 %vm423_vm3, %v2471_v22  ;;  %v438_v36 = vsel %vm427_vm1, %v1461_v28, 0  ;;  %v1771_v38 = vor.u32 %v1878_v34, %v1768_v35  ;;  %v1845_v40 = vld [vmem:[%s2462_s8 + $0x134] sm:$0xf0]  ;;  %1472 = vmatmul.msk.bf16.vlgmr.msra.gmra.mxu2 %vm423_vm3, %v2471_v22  ;;  %v1842_v43 = vld [vmem:[%s2462_s8 + $0x124] sm:$0xf]  ;;  %s340_s23 = scalar_lea.vmem [#allocation9], %s1891_s10 }
  0x72   : > { %1057 = vmatpush.bf16.msrb.mxu2 %v1647_v20  ;;  %492 = vmatpush.bf16.msrb.mxu3 %v438_v36  ;;  %v444_v41 = vsel %vm427_vm1, %v1469_v32, 0  ;;  %v1623_v42 = vor.u32 %v1845_v40, %v1622_v39  ;;  %v1624_v44 = vld [vmem:[%s2462_s8 + $0x138] sm:$0xf0]  ;;  %v1040_v45 = vand.u32 %v1767_v37, %v2477_v27  ;;  %v1742_v48 = vld [vmem:[%s2462_s8 + $0x210] sm:$0xf]  ;;  %s1884_s30 = smul.u32 12, %s2299_s25 }
  0x73   : > { %1083 = vmatpush.bf16.msrb.mxu0 %v1651_v24  ;;  %518 = vmatpush.bf16.msrb.mxu1 %v444_v41  ;;  %v1043_v46 = vand.u32 %v1771_v38, %v2477_v27  ;;  %v1627_v47 = vor.u32 %v1842_v43, %v1624_v44  ;;  %v1875_v49 = vld [vmem:[%s2462_s8 + $0x224] sm:$0xf0]  ;;  %v1872_v50 = vld [vmem:[%s2462_s8 + $0x214] sm:$0xf]  ;;  %v1744_v51 = vld [vmem:[%s2462_s8 + $0x228] sm:$0xf0] }
  0x74   : > { %1474 = vmatmul.msk.bf16.vlgmr.msra.gmra.mxu0 %vm423_vm3, %v2471_v22  ;;  %v1598_v52 = vld [vmem:[%s2462_s8 + $0xf0] sm:$0xf]  ;;  %v1839_v53 = vld [vmem:[%s2462_s8 + $0x104] sm:$0xf0]  ;;  %v1743_v54 = vor.u32 %v1875_v49, %v1742_v48  ;;  %v1747_v55 = vor.u32 %v1872_v50, %v1744_v51  ;;  %v1836_v57 = vld [vmem:[%s2462_s8 + $0xf4] sm:$0xf]  ;;  %s1254_s13 = scalar_lea.hbm %s2753_s5, %s1884_s30 }
  0x75   : > { %v1599_v56 = vor.u32 %v1839_v53, %v1598_v52  ;;  %v1600_v58 = vld [vmem:[%s2462_s8 + $0x108] sm:$0xf0]  ;;  %v1718_v59 = vld [vmem:[%s2462_s8 + $0x1e0] sm:$0xf]  ;;  %v1869_v61 = vld [vmem:[%s2462_s8 + $0x1f4] sm:$0xf0] }
  0x76   : > { %1058 = vmatpush.bf16.msrb.mxu2 %v1623_v42  ;;  %1073 = vmatpush.bf16.msra.mxu3 %v1040_v45  ;;  %v1603_v60 = vor.u32 %v1836_v57, %v1600_v58  ;;  %v1866_v62 = vld [vmem:[%s2462_s8 + $0x1e4] sm:$0xf]  ;;  %v1720_v63 = vld [vmem:[%s2462_s8 + $0x1f8] sm:$0xf0]  ;;  %v1574_v0 = vld [vmem:[%s2462_s8 + $0xc0] sm:$0xf]  ;;  %v1719_v5 = vor.u32 %v1869_v61, %v1718_v59 }
  0x77   : > { %1099 = vmatpush.bf16.msra.mxu1 %v1043_v46  ;;  %1084 = vmatpush.bf16.msrb.mxu0 %v1627_v47  ;;  %v1833_v1 = vld [vmem:[%s2462_s8 + $0xd4] sm:$0xf0]  ;;  %v1830_v2 = vld [vmem:[%s2462_s8 + $0xc4] sm:$0xf]  ;;  %v1576_v4 = vld [vmem:[%s2462_s8 + $0xd8] sm:$0xf0]  ;;  %v1723_v6 = vor.u32 %v1866_v62, %v1720_v63 }
  0x78   : > { %v1575_v3 = vor.u32 %v1833_v1, %v1574_v0  ;;  %v1694_v7 = vld [vmem:[%s2462_s8 + $0x1b0] sm:$0xf]  ;;  %v1863_v8 = vld [vmem:[%s2462_s8 + $0x1c4] sm:$0xf0]  ;;  %v1579_v10 = vor.u32 %v1830_v2, %v1576_v4  ;;  %v1860_v11 = vld [vmem:[%s2462_s8 + $0x1b4] sm:$0xf] }
  0x79   : > { %v1550_v9 = vld [vmem:[%s2462_s8 + $0x90] sm:$0xf]  ;;  %v1696_v12 = vld [vmem:[%s2462_s8 + $0x1c8] sm:$0xf0]  ;;  %v1827_v13 = vld [vmem:[%s2462_s8 + $0xa4] sm:$0xf0]  ;;  %v1695_v18 = vor.u32 %v1863_v8, %v1694_v7 }
  0x7a   : > { %1059 = vmatpush.bf16.msrb.mxu2 %v1599_v56  ;;  %1074 = vmatpush.bf16.msra.mxu3 %v1743_v54  ;;  %v1824_v14 = vld [vmem:[%s2462_s8 + $0x94] sm:$0xf]  ;;  %v1552_v15 = vld [vmem:[%s2462_s8 + $0xa8] sm:$0xf0]  ;;  %v1551_v16 = vor.u32 %v1827_v13, %v1550_v9  ;;  %v1670_v17 = vld [vmem:[%s2462_s8 + $0x180] sm:$0xf]  ;;  %v1699_v19 = vor.u32 %v1860_v11, %v1696_v12 }
  0x7b   : > { %1100 = vmatpush.bf16.msra.mxu1 %v1747_v55  ;;  %1085 = vmatpush.bf16.msrb.mxu0 %v1603_v60  ;;  %v1857_v20 = vld [vmem:[%s2462_s8 + $0x194] sm:$0xf0]  ;;  %v1526_v21 = vld [vmem:[%s2462_s8 + $0x60] sm:$0xf]  ;;  %v1555_v24 = vor.u32 %v1824_v14, %v1552_v15  ;;  %v1854_v25 = vld [vmem:[%s2462_s8 + $0x184] sm:$0xf] }
  0x7c   : > { %v1821_v23 = vld [vmem:[%s2462_s8 + $0x74] sm:$0xf0]  ;;  %v1672_v26 = vld [vmem:[%s2462_s8 + $0x198] sm:$0xf0]  ;;  %v1818_v28 = vld [vmem:[%s2462_s8 + $0x64] sm:$0xf]  ;;  %v1671_v35 = vor.u32 %v1857_v20, %v1670_v17 }
  0x7d   : > { %v1528_v29 = vld [vmem:[%s2462_s8 + $0x78] sm:$0xf0]  ;;  %v1654_v30 = vld [vmem:[%s2462_s8 + $0x158] sm:$0xf]  ;;  %v1852_v31 = vld [vmem:[%s2462_s8 + $0x16c] sm:$0xf0]  ;;  %v1527_v32 = vor.u32 %v1821_v23, %v1526_v21  ;;  %v1675_v36 = vor.u32 %v1854_v25, %v1672_v26 }
  0x7e   : > { %1060 = vmatpush.bf16.msrb.mxu2 %v1575_v3  ;;  %1075 = vmatpush.bf16.msra.mxu3 %v1719_v5  ;;  %v1849_v33 = vld [vmem:[%s2462_s8 + $0x15c] sm:$0xf]  ;;  %v1656_v34 = vld [vmem:[%s2462_s8 + $0x170] sm:$0xf0]  ;;  %v1502_v37 = vld [vmem:[%s2462_s8 + $0x30] sm:$0xf]  ;;  %v1531_v39 = vor.u32 %v1818_v28, %v1528_v29  ;;  %v1655_v40 = vor.u32 %v1852_v31, %v1654_v30 }
  0x7f   : > { %1101 = vmatpush.bf16.msra.mxu1 %v1723_v6  ;;  %1086 = vmatpush.bf16.msrb.mxu0 %v1579_v10  ;;  %v1815_v38 = vld [vmem:[%s2462_s8 + $0x44] sm:$0xf0]  ;;  %v1812_v41 = vld [vmem:[%s2462_s8 + $0x34] sm:$0xf]  ;;  %v1504_v42 = vld [vmem:[%s2462_s8 + $0x48] sm:$0xf0]  ;;  %v1659_v44 = vor.u32 %v1849_v33, %v1656_v34 }
  0x80   : > { %1473 = vmatmul.msk.bf16.vlgmr.msrb.gmra.mxu3 %vm423_vm3, %v2471_v22  ;;  %v1630_v43 = vld [vmem:[%s2462_s8 + $0x128] sm:$0xf]  ;;  %v1846_v45 = vld [vmem:[%s2462_s8 + $0x13c] sm:$0xf0]  ;;  %v1843_v46 = vld [vmem:[%s2462_s8 + $0x12c] sm:$0xf]  ;;  %v1503_v48 = vor.u32 %v1815_v38, %v1502_v37  ;;  %v1507_v55 = vor.u32 %v1812_v41, %v1504_v42 }
  0x81   : > { %1475 = vmatmul.msk.bf16.vlgmr.msrb.gmra.mxu1 %vm423_vm3, %v2471_v22  ;;  %v1632_v47 = vld [vmem:[%s2462_s8 + $0x140] sm:$0xf0]  ;;  %v1478_v49 = vld [vmem:[%s2462_s8] sm:$0xf]  ;;  %v1774_v50 = vld [vmem:[%s2462_s8 + $0x248] sm:$0xf]  ;;  %v1631_v56 = vor.u32 %v1846_v45, %v1630_v43 }
  0x82   : > { %1061 = vmatpush.bf16.msrb.mxu2 %v1551_v16  ;;  %1076 = vmatpush.bf16.msra.mxu3 %v1695_v18  ;;  %v1882_v22 = vld [vmem:[%s2462_s8 + $0x25c] sm:$0xf0]  ;;  %v1809_v51 = vld [vmem:[%s2462_s8 + $0x14] sm:$0xf0]  ;;  %v1879_v53 = vld [vmem:[%s2462_s8 + $0x24c] sm:$0xf]  ;;  %v1635_v58 = vor.u32 %v1843_v46, %v1632_v47 }
  0x83   : > { %1102 = vmatpush.bf16.msra.mxu1 %v1699_v19  ;;  %1087 = vmatpush.bf16.msrb.mxu0 %v1555_v24  ;;  %v1775_v52 = vor.u32 %v1882_v22, %v1774_v50  ;;  %v1776_v54 = vld [vmem:[%s2462_s8 + $0x260] sm:$0xf0]  ;;  %v1480_v59 = vld [vmem:[%s2462_s8 + $0x18] sm:$0xf0]  ;;  %v1606_v60 = vld [vmem:[%s2462_s8 + $0xf8] sm:$0xf]  ;;  %v1479_v63 = vor.u32 %v1809_v51, %v1478_v49 }
  0x84   : > { %v1806_v57 = vld [vmem:[%s2462_s8 + $0x4] sm:$0xf]  ;;  %v1840_v61 = vld [vmem:[%s2462_s8 + $0x10c] sm:$0xf0]  ;;  %v1779_v62 = vor.u32 %v1879_v53, %v1776_v54  ;;  %v1837_v0 = vld [vmem:[%s2462_s8 + $0xfc] sm:$0xf] }
  0x85   : > { %v1608_v1 = vld [vmem:[%s2462_s8 + $0x110] sm:$0xf0]  ;;  %v564_v2 = vld [vmem:[#allocation5] sm:$0x3]  ;;  %v1046_v3 = vand.u32 %v1775_v52, %v2477_v27  ;;  %v1483_v4 = vor.u32 %v1806_v57, %v1480_v59  ;;  %v1607_v5 = vor.u32 %v1840_v61, %v1606_v60  ;;  %v1750_v6 = vld [vmem:[%s2462_s8 + $0x218] sm:$0xf] }
  0x86   : > { %1062 = vmatpush.bf16.msrb.mxu2 %v1527_v32  ;;  %1077 = vmatpush.bf16.msra.mxu3 %v1671_v35  ;;  %644 = vst [vmem:[#allocation1] ss:$9 sm:$0xff] %v564_v2  ;;  %v1876_v7 = vld [vmem:[%s2462_s8 + $0x22c] sm:$0xf0]  ;;  %v1611_v8 = vor.u32 %v1837_v0, %v1608_v1  ;;  %v1049_v9 = vand.u32 %v1779_v62, %v2477_v27  ;;  %v1582_v10 = vld [vmem:[%s2462_s8 + $0xc8] sm:$0xf] }
  0x87   : > { %1103 = vmatpush.bf16.msra.mxu1 %v1675_v36  ;;  %1088 = vmatpush.bf16.msrb.mxu0 %v1531_v39  ;;  %v1834_v11 = vld [vmem:[%s2462_s8 + $0xdc] sm:$0xf0]  ;;  %v1831_v12 = vld [vmem:[%s2462_s8 + $0xcc] sm:$0xf]  ;;  %v1584_v13 = vld [vmem:[%s2462_s8 + $0xe0] sm:$0xf0]  ;;  %v1751_v16 = vor.u32 %v1876_v7, %v1750_v6 }
  0x88   : > { %v1873_v14 = vld [vmem:[%s2462_s8 + $0x21c] sm:$0xf]  ;;  %v1752_v15 = vld [vmem:[%s2462_s8 + $0x230] sm:$0xf0]  ;;  %v1558_v17 = vld [vmem:[%s2462_s8 + $0x98] sm:$0xf]  ;;  %v1583_v18 = vor.u32 %v1834_v11, %v1582_v10  ;;  %v1587_v23 = vor.u32 %v1831_v12, %v1584_v13 }
  0x89   : > { %v1828_v19 = vld [vmem:[%s2462_s8 + $0xac] sm:$0xf0]  ;;  %v1726_v20 = vld [vmem:[%s2462_s8 + $0x1e8] sm:$0xf]  ;;  %v1870_v21 = vld [vmem:[%s2462_s8 + $0x1fc] sm:$0xf0]  ;;  %v1755_v24 = vor.u32 %v1873_v14, %v1752_v15 }
  0x8a   : > { %1109 = vmatpush.bf16.msrb.mxu3 %v1655_v40  ;;  %1063 = vmatpush.bf16.msrb.mxu2 %v1503_v48  ;;  %v1825_v25 = vld [vmem:[%s2462_s8 + $0x9c] sm:$0xf]  ;;  %v1560_v26 = vld [vmem:[%s2462_s8 + $0xb0] sm:$0xf0]  ;;  %v1867_v28 = vld [vmem:[%s2462_s8 + $0x1ec] sm:$0xf]  ;;  %v1727_v32 = vor.u32 %v1870_v21, %v1726_v20  ;;  %v1559_v33 = vor.u32 %v1828_v19, %v1558_v17 }
  0x8b   : > { %1135 = vmatpush.bf16.msrb.mxu1 %v1659_v44  ;;  %1089 = vmatpush.bf16.msrb.mxu0 %v1507_v55  ;;  %v1728_v31 = vld [vmem:[%s2462_s8 + $0x200] sm:$0xf0]  ;;  %v1702_v34 = vld [vmem:[%s2462_s8 + $0x1b8] sm:$0xf]  ;;  %v1864_v35 = vld [vmem:[%s2462_s8 + $0x1cc] sm:$0xf0]  ;;  %v1563_v36 = vor.u32 %v1825_v25, %v1560_v26 }
  0x8c   : > { %v1731_v37 = vor.u32 %v1867_v28, %v1728_v31  ;;  %v1534_v38 = vld [vmem:[%s2462_s8 + $0x68] sm:$0xf]  ;;  %v1822_v39 = vld [vmem:[%s2462_s8 + $0x7c] sm:$0xf0]  ;;  %v1819_v40 = vld [vmem:[%s2462_s8 + $0x6c] sm:$0xf]  ;;  %v1703_v44 = vor.u32 %v1864_v35, %v1702_v34 }
  0x8d   : > { %v2578_v29 = vld [vmem:[#allocation1] sm:$0xff]  ;;  %v2580_v30 = vld [vmem:[#allocation1 + $0x9] sm:$0xff]  ;;  %v1535_v47 = vor.u32 %v1822_v39, %v1534_v38  ;;  %s1892_s26 = smul.u32 12, %s2444_s7  ;;  %vm553_vm5 = vcmask 1041408   ;;  %vm555_vm6 = vcmask 1045508   ;;  %s1258_s14 = sshll.u32 %s1254_s13, 4  ;;  %s1259_s14 = int_to_ptr.hbm [resolvable:$true] %s1258_s14 }
  0x8e   : > { %1110 = vmatpush.bf16.msrb.mxu3 %v1631_v56  ;;  %1064 = vmatpush.bf16.msrb.mxu2 %v1479_v63  ;;  %v1536_v41 = vld [vmem:[%s2462_s8 + $0x80] sm:$0xf0]  ;;  %v1861_v42 = vld [vmem:[%s2462_s8 + $0x1bc] sm:$0xf]  ;;  %v1704_v43 = vld [vmem:[%s2462_s8 + $0x1d0] sm:$0xf0] }
  0x8f   : > { %1136 = vmatpush.bf16.msrb.mxu1 %v1635_v58  ;;  %1090 = vmatpush.bf16.msrb.mxu0 %v1483_v4  ;;  %v1510_v45 = vld [vmem:[%s2462_s8 + $0x38] sm:$0xf]  ;;  %v1816_v46 = vld [vmem:[%s2462_s8 + $0x4c] sm:$0xf0]  ;;  %v1813_v48 = vld [vmem:[%s2462_s8 + $0x3c] sm:$0xf]  ;;  %v1539_v51 = vor.u32 %v1819_v40, %v1536_v41  ;;  %v1707_v52 = vor.u32 %v1861_v42, %v1704_v43 }
  0x90   : > { %1788 = vmatmul.msk.bf16.vlgmr.msra.gmra.mxu3 %vm1032_vm4, %v2580_v30  ;;  %v1512_v49 = vld [vmem:[%s2462_s8 + $0x50] sm:$0xf0]  ;;  %v1678_v50 = vld [vmem:[%s2462_s8 + $0x188] sm:$0xf]  ;;  %v1858_v22 = vld [vmem:[%s2462_s8 + $0x19c] sm:$0xf0]  ;;  %v1511_v62 = vor.u32 %v1816_v46, %v1510_v45 }
  0x91   : > { %1065 = vmatmul.bf16.vlgmr.msrb.gmra.mxu2 %v2578_v29  ;;  %1789 = vmatmul.msk.bf16.vlgmr.msra.gmra.mxu1 %vm1032_vm4, %v2580_v30  ;;  %v1855_v53 = vld [vmem:[%s2462_s8 + $0x18c] sm:$0xf]  ;;  %v1662_v54 = vld [vmem:[%s2462_s8 + $0x160] sm:$0xf]  ;;  %v1853_v55 = vld [vmem:[%s2462_s8 + $0x174] sm:$0xf0]  ;;  %v1679_v59 = vor.u32 %v1858_v22, %v1678_v50  ;;  %v1515_v2 = vor.u32 %v1813_v48, %v1512_v49 }
  0x92   : > { %1125 = vmatpush.bf16.msra.mxu2 %v1046_v3  ;;  %1111 = vmatpush.bf16.msrb.mxu3 %v1607_v5  ;;  %v1680_v56 = vld [vmem:[%s2462_s8 + $0x1a0] sm:$0xf0]  ;;  %v1782_v57 = vld [vmem:[%s2462_s8 + $0x250] sm:$0xf]  ;;  %v1883_v58 = vld [vmem:[%s2462_s8 + $0x264] sm:$0xf0]  ;;  %v1663_v63 = vor.u32 %v1853_v55, %v1662_v54 }
  0x93   : > { %1137 = vmatpush.bf16.msrb.mxu1 %v1611_v8  ;;  %1151 = vmatpush.bf16.msra.mxu0 %v1049_v9  ;;  %v1850_v60 = vld [vmem:[%s2462_s8 + $0x164] sm:$0xf]  ;;  %v1664_v61 = vld [vmem:[%s2462_s8 + $0x178] sm:$0xf0]  ;;  %v1486_v0 = vld [vmem:[%s2462_s8 + $0x8] sm:$0xf]  ;;  %v1683_v3 = vor.u32 %v1855_v53, %v1680_v56  ;;  %v1783_v7 = vor.u32 %v1883_v58, %v1782_v57 }
  0x94   : > { %1091 = vmatmul.bf16.vlgmr.msrb.gmra.mxu0 %v2578_v29  ;;  %v1810_v1 = vld [vmem:[%s2462_s8 + $0x1c] sm:$0xf0]  ;;  %v1807_v4 = vld [vmem:[%s2462_s8 + $0xc] sm:$0xf]  ;;  %v1638_v5 = vld [vmem:[%s2462_s8 + $0x130] sm:$0xf]  ;;  %v1667_v8 = vor.u32 %v1850_v60, %v1664_v61 }
  0x95   : > { %v1847_v6 = vld [vmem:[%s2462_s8 + $0x144] sm:$0xf0]  ;;  %v1488_v9 = vld [vmem:[%s2462_s8 + $0x20] sm:$0xf0]  ;;  %v1880_v10 = vld [vmem:[%s2462_s8 + $0x254] sm:$0xf]  ;;  %v1487_v14 = vor.u32 %v1810_v1, %v1486_v0  ;;  %v1052_v17 = vand.u32 %v1783_v7, %v2477_v27 }
  0x96   : > { %1126 = vmatpush.bf16.msra.mxu2 %v1751_v16  ;;  %1112 = vmatpush.bf16.msrb.mxu3 %v1583_v18  ;;  %v1784_v11 = vld [vmem:[%s2462_s8 + $0x268] sm:$0xf0]  ;;  %v1844_v12 = vld [vmem:[%s2462_s8 + $0x134] sm:$0xf]  ;;  %v1639_v15 = vor.u32 %v1847_v6, %v1638_v5  ;;  %v1491_v16 = vor.u32 %v1807_v4, %v1488_v9  ;;  %v1614_v18 = vld [vmem:[%s2462_s8 + $0x100] sm:$0xf] }
  0x97   : > { %1138 = vmatpush.bf16.msrb.mxu1 %v1587_v23  ;;  %1152 = vmatpush.bf16.msra.mxu0 %v1755_v24  ;;  %v1640_v13 = vld [vmem:[%s2462_s8 + $0x148] sm:$0xf0]  ;;  %v1841_v19 = vld [vmem:[%s2462_s8 + $0x114] sm:$0xf0]  ;;  %v1787_v20 = vor.u32 %v1880_v10, %v1784_v11  ;;  %v1758_v23 = vld [vmem:[%s2462_s8 + $0x220] sm:$0xf] }
  0x98   : > { %v1643_v21 = vor.u32 %v1844_v12, %v1640_v13  ;;  %v1877_v24 = vld [vmem:[%s2462_s8 + $0x234] sm:$0xf0]  ;;  %v1838_v25 = vld [vmem:[%s2462_s8 + $0x104] sm:$0xf]  ;;  %v1616_v26 = vld [vmem:[%s2462_s8 + $0x118] sm:$0xf0]  ;;  %v1615_v28 = vor.u32 %v1841_v19, %v1614_v18 }
  0x99   : > { %v1759_v31 = vor.u32 %v1877_v24, %v1758_v23  ;;  %v1835_v34 = vld [vmem:[%s2462_s8 + $0xe4] sm:$0xf0]  ;;  %v1734_v35 = vld [vmem:[%s2462_s8 + $0x1f0] sm:$0xf]  ;;  %v1874_v38 = vld [vmem:[%s2462_s8 + $0x224] sm:$0xf] }
  0x9a   : > { %1127 = vmatpush.bf16.msra.mxu2 %v1727_v32  ;;  %1113 = vmatpush.bf16.msrb.mxu3 %v1559_v33  ;;  %v1055_v32 = vand.u32 %v1787_v20, %v2477_v27  ;;  %v1590_v33 = vld [vmem:[%s2462_s8 + $0xd0] sm:$0xf]  ;;  %v1760_v39 = vld [vmem:[%s2462_s8 + $0x238] sm:$0xf0]  ;;  %v1832_v27 = vld [vmem:[%s2462_s8 + $0xd4] sm:$0xf] }
  0x9b   : > { %1139 = vmatpush.bf16.msrb.mxu1 %v1563_v36  ;;  %1153 = vmatpush.bf16.msra.mxu0 %v1731_v37  ;;  %v1619_v36 = vor.u32 %v1838_v25, %v1616_v26  ;;  %v1871_v37 = vld [vmem:[%s2462_s8 + $0x204] sm:$0xf0]  ;;  %v1592_v40 = vld [vmem:[%s2462_s8 + $0xe8] sm:$0xf0]  ;;  %v1591_v41 = vor.u32 %v1835_v34, %v1590_v33  ;;  %v1763_v43 = vor.u32 %v1874_v38, %v1760_v39  ;;  %v1829_v45 = vld [vmem:[%s2462_s8 + $0xb4] sm:$0xf0] }
  0x9c   : > { %v1735_v42 = vor.u32 %v1871_v37, %v1734_v35  ;;  %v1710_v46 = vld [vmem:[%s2462_s8 + $0x1c0] sm:$0xf]  ;;  %v1865_v48 = vld [vmem:[%s2462_s8 + $0x1d4] sm:$0xf0]  ;;  %v1868_v49 = vld [vmem:[%s2462_s8 + $0x1f4] sm:$0xf] }
  0x9d   : > { %v1736_v50 = vld [vmem:[%s2462_s8 + $0x208] sm:$0xf0]  ;;  %v1826_v22 = vld [vmem:[%s2462_s8 + $0xa4] sm:$0xf]  ;;  %v1711_v53 = vor.u32 %v1865_v48, %v1710_v46  ;;  %v1542_v55 = vld [vmem:[%s2462_s8 + $0x70] sm:$0xf] }
  0x9e   : > { %1128 = vmatpush.bf16.msra.mxu2 %v1703_v44  ;;  %1114 = vmatpush.bf16.msrb.mxu3 %v1535_v47  ;;  %v1566_v44 = vld [vmem:[%s2462_s8 + $0xa0] sm:$0xf]  ;;  %v1595_v47 = vor.u32 %v1832_v27, %v1592_v40  ;;  %v1739_v54 = vor.u32 %v1868_v49, %v1736_v50  ;;  %v1823_v56 = vld [vmem:[%s2462_s8 + $0x84] sm:$0xf0]  ;;  %v1686_v57 = vld [vmem:[%s2462_s8 + $0x190] sm:$0xf] }
  0x9f   : > { %1140 = vmatpush.bf16.msrb.mxu1 %v1539_v51  ;;  %1154 = vmatpush.bf16.msra.mxu0 %v1707_v52  ;;  %v1568_v51 = vld [vmem:[%s2462_s8 + $0xb8] sm:$0xf0]  ;;  %v1567_v52 = vor.u32 %v1829_v45, %v1566_v44  ;;  %v1862_v60 = vld [vmem:[%s2462_s8 + $0x1c4] sm:$0xf]  ;;  %v1543_v0 = vor.u32 %v1823_v56, %v1542_v55  ;;  %v1817_v4 = vld [vmem:[%s2462_s8 + $0x54] sm:$0xf0] }
  0xa0   : > { %v1571_v58 = vor.u32 %v1826_v22, %v1568_v51  ;;  %v1712_v61 = vld [vmem:[%s2462_s8 + $0x1d8] sm:$0xf0]  ;;  %v1856_v6 = vld [vmem:[%s2462_s8 + $0x194] sm:$0xf]  ;;  %v1688_v7 = vld [vmem:[%s2462_s8 + $0x1a8] sm:$0xf0] }
  0xa1   : > { %v1520_v9 = vld [vmem:[%s2462_s8 + $0x58] sm:$0xf0]  ;;  %v1691_v11 = vor.u32 %v1856_v6, %v1688_v7  ;;  %v1494_v12 = vld [vmem:[%s2462_s8 + $0x10] sm:$0xf]  ;;  %v1811_v13 = vld [vmem:[%s2462_s8 + $0x24] sm:$0xf0] }
  0xa2   : > { %1129 = vmatpush.bf16.msra.mxu2 %v1679_v59  ;;  %1115 = vmatpush.bf16.msrb.mxu3 %v1511_v62  ;;  %v1859_v59 = vld [vmem:[%s2462_s8 + $0x1a4] sm:$0xf0]  ;;  %v1820_v62 = vld [vmem:[%s2462_s8 + $0x74] sm:$0xf]  ;;  %s377_s0 = scalar_lea.vmem [#allocation10], %s1892_s26  ;;  %vm557_vm7 = vcmask 1043456  }
  0xa3   : > { %1141 = vmatpush.bf16.msrb.mxu1 %v1515_v2  ;;  %1155 = vmatpush.bf16.msra.mxu0 %v1683_v3  ;;  %v1687_v1 = vor.u32 %v1859_v59, %v1686_v57  ;;  %v1715_v2 = vor.u32 %v1862_v60, %v1712_v61  ;;  %v1518_v3 = vld [vmem:[%s2462_s8 + $0x40] sm:$0xf]  ;;  %s1256_s27 = sshll.u32 %s377_s0, 4  ;;  %s1238_s21 = scalar_lea.sflag [#allocation4], %s2444_s7  ;;  %s1257_s27 = int_to_ptr.vmem [resolvable:$true] %s1256_s27 }
  0xa4   : > { %v1519_v10 = vor.u32 %v1817_v4, %v1518_v3  ;;  %v391_v26 = vld [vmem:[%s340_s23] sm:$0x3f]  ;;  %s2143_s20 = sshra.s32 %s1259_s14, 4  ;;  %s2149_s18 = scalar_lea.hbm %s2753_s5, 24  ;;  %s2144_s20 = int_to_ptr.hbm [resolvable:$true] %s2143_s20 }
  0xa5   : > { %1790 = vmatmul.msk.bf16.vlgmr.msra.gmra.mxu2 %vm1032_vm4, %v2580_v30  ;;  %v527_v33 = vperm.slane %v391_v26, 2  ;;  %v525_v35 = vperm.slane %v391_v26, 0  ;;  %v528_v27 = vperm.slane %v391_v26, 3  ;;  %s2145_s17 = scalar_lea.hbm %s2144_s20, 12  ;;  %p2150_p5 = scmp.lt.s32.totalorder %s2144_s20, %s2753_s5 }
  0xa6   : > { %1161 = vmatpush.bf16.msrb.mxu2 %v1663_v63  ;;  %1116 = vmatpush.bf16.msrb.mxu3 %v1487_v14  ;;  %v1544_v63 = vld [vmem:[%s2462_s8 + $0x88] sm:$0xf0]  ;;  %p2146_p6 = scmp.ne.s32.totalorder %s2144_s20, %s2145_s17  ;;  %p2151_p2 = scmp.lt.s32.totalorder %s2149_s18, %s2145_s17 }
  0xa7   : > { %1187 = vmatpush.bf16.msrb.mxu0 %v1667_v8  ;;  %1142 = vmatpush.bf16.msrb.mxu1 %v1491_v16  ;;  %v1547_v5 = vor.u32 %v1820_v62, %v1544_v63  ;;  %v1814_v8 = vld [vmem:[%s2462_s8 + $0x44] sm:$0xf]  ;;  %v1496_v16 = vld [vmem:[%s2462_s8 + $0x28] sm:$0xf0] }
  0xa8   : > { %1791 = vmatmul.msk.bf16.vlgmr.msra.gmra.mxu0 %vm1032_vm4, %v2580_v30  ;;  %v1523_v14 = vor.u32 %v1814_v8, %v1520_v9  ;;  %p2147_p13 = pnand %p2146_p6, %p2330_p11  ;;  %p2152_p9 = por %p2151_p2, %p2150_p5 }
  0xa9   : > { %1117 = vmatmul.bf16.vlgmr.msrb.gmra.mxu3 %v2578_v29 }
  0xaa   : > { %1162 = vmatpush.bf16.msrb.mxu2 %v1639_v15  ;;  %1177 = vmatpush.bf16.msra.mxu3 %v1052_v17  ;;  %v1808_v15 = vld [vmem:[%s2462_s8 + $0x14] sm:$0xf]  ;;  %v1495_v17 = vor.u32 %v1811_v13, %v1494_v12  ;;  %p2148_p7 = pneg %p2147_p13 }
  0xab   : > { %1188 = vmatpush.bf16.msrb.mxu0 %v1643_v21  ;;  %1143 = vmatmul.bf16.vlgmr.msrb.gmra.mxu1 %v2578_v29  ;;  %v1499_v18 = vor.u32 %v1808_v15, %v1496_v16 }
  0xac   : > { %1203 = vmatpush.bf16.msra.mxu1 %v1055_v32  ;;  %v530_v32 = vperm.slane %v391_v26, 5  ;;  %p2153_p10 = pnand %p2152_p9, %p2148_p7 }
  0xae   : > { %1163 = vmatpush.bf16.msrb.mxu2 %v1615_v28  ;;  %1178 = vmatpush.bf16.msra.mxu3 %v1759_v31  ;;  %v526_v28 = vperm.slane %v391_v26, 1 }
  0xaf   : > { %1189 = vmatpush.bf16.msrb.mxu0 %v1619_v36 }
  0xb0   : > { %1204 = vmatpush.bf16.msra.mxu1 %v1763_v43 }
  0xb2   : > { %1164 = vmatpush.bf16.msrb.mxu2 %v1591_v41  ;;  %1179 = vmatpush.bf16.msra.mxu3 %v1735_v42 }
  0xb3   : > { %1190 = vmatpush.bf16.msrb.mxu0 %v1595_v47 }
  0xb4   : > { %1205 = vmatpush.bf16.msra.mxu1 %v1739_v54 }
  0xb6   : > { %1165 = vmatpush.bf16.msrb.mxu2 %v1567_v52  ;;  %1180 = vmatpush.bf16.msra.mxu3 %v1711_v53 }
  0xb7   : > { %1191 = vmatpush.bf16.msrb.mxu0 %v1571_v58 }
  0xb8   : > { %1206 = vmatpush.bf16.msra.mxu1 %v1715_v2 }
  0xba   : > { %1166 = vmatpush.bf16.msrb.mxu2 %v1543_v0  ;;  %1181 = vmatpush.bf16.msra.mxu3 %v1687_v1 }
  0xbb   : > { %1192 = vmatpush.bf16.msrb.mxu0 %v1547_v5 }
  0xbc   : > { %1207 = vmatpush.bf16.msra.mxu1 %v1691_v11 }
  0xbd   : > { %1792 = vmatmul.msk.bf16.vlgmr.msra.gmra.mxu3 %vm1032_vm4, %v2580_v30 }
  0xbe   : > { %1167 = vmatpush.bf16.msrb.mxu2 %v1519_v10 }
  0xbf   : > { %1193 = vmatpush.bf16.msrb.mxu0 %v1523_v14  ;;  %1793 = vmatmul.msk.bf16.vlgmr.msra.gmra.mxu1 %vm1032_vm4, %v2580_v30  ;;  %v529_v30 = vperm.slane %v391_v26, 4 }
  0xc2   : > { %1168 = vmatpush.bf16.msrb.mxu2 %v1495_v17 }
  0xc3   : > { %1194 = vmatpush.bf16.msrb.mxu0 %v1499_v18 }
  0xc5   : > { %1169 = vmatmul.bf16.vlgmr.msrb.gmra.mxu2 %v2578_v29 }
  0xc6   : > { %1195 = vmatmul.bf16.vlgmr.msrb.gmra.mxu0 %v2578_v29 }
  0xee   : > { %v468_v19 = vpop.f32.mrf.mxu1 }
  0xef   : > { %v538_v29 = vadd.f32 %v526_v28, %v468_v19 }
  0xf1   : > { %v507_v20 = vpop.f32.mrf.mxu0  ;;  %v549_v41 = vrot.slane %v538_v29, 6 }
  0xf2   : > { %v455_v21 = vpop.f32.mrf.mxu3  ;;  %v2677_v37 = vadd.f32 %v529_v30, %v507_v20 }
  0xf3   : > { %v537_v43 = vadd.f32 %v525_v35, %v455_v21 }
  0xf4   : > { %v481_v23 = vpop.f32.mrf.mxu2 }
  0xf5   : > { %v539_v39 = vadd.f32 %v527_v33, %v481_v23  ;;  %v554_v49 = vsel %vm553_vm5, %v537_v43, %v549_v41 }
  0xf6   : > { %v470_v24 = vpop.f32.mrf.mxu1 }
  0xf7   : > { %v550_v45 = vrot.slane %v539_v39, 4 }
  0xf9   : > { %v509_v25 = vpop.f32.mrf.mxu0 }
  0xfa   : > { %v457_v31 = vpop.f32.mrf.mxu3 }
  0xfc   : > { %v483_v34 = vpop.f32.mrf.mxu2 }
  0xfe   : > { %v520_v36 = vpop.f32.mrf.mxu1 }
  0xff   : > { %v2679_v38 = vadd.f32 %v530_v32, %v520_v36 }
 0x101   : > { %v552_v40 = vrot.slane %v2679_v38, 6 }
 0x103   : > { %v494_v42 = vpop.f32.mrf.mxu3  ;;  %v559_v44 = vsel %vm553_vm5, %v2677_v37, %v552_v40 }
 0x104   : > { %v540_v46 = vadd.f32 %v528_v27, %v494_v42  ;;  %563 = vst [vmem:[%s377_s0 + $0x8] sm:$0xf] %v559_v44 }
 0x106   : > { %v551_v47 = vrot.slane %v540_v46, 2  ;;  %v522_v48 = vpop.f32.mrf.mxu1 }
 0x108   : > { %v556_v50 = vsel %vm555_vm6, %v550_v45, %v551_v47 }
 0x109   : > { %v558_v22 = vsel %vm557_vm7, %v554_v49, %v556_v50 }
 0x10a   : > { %562 = vst [vmem:[%s377_s0] sm:$0xff] %v558_v22 }
 0x10b   : > { %v496_v51 = vpop.f32.mrf.mxu3 }
 0x10c   : > { %2156 = shalt.err (!%p2153_p10)
}
 0x10d   : > { %1907 = dma.vmem_to_hbm [thread:$0]  (%p2330_p11), %s1257_s27, 192, %s1259_s14, %s1238_s21  }
 0x10e   : > { %v1105_v53 = vpop.f32.mrf.mxu1  ;;  %s384_s15 = scalar_lea.vmem [#allocation11], %s1892_s26  ;;  %s2789_s8 = sld [smem:[#allocation26_spill]] }
 0x10f   : > { %s1271_s23 = sshll.u32 %s384_s15, 4  ;;  %s1243_s25 = scalar_lea.sflag [#allocation12], %s2444_s7  ;;  %s1272_s23 = int_to_ptr.vmem [resolvable:$true] %s1271_s23 }
 0x111   : > { %v1092_v52 = vpop.f32.mrf.mxu0 }
 0x112   : > { %v1106_v62 = vadd.f32 %v1105_v53, %v1092_v52 }
 0x113   : > { %v1079_v54 = vpop.f32.mrf.mxu3 }
 0x114   : > { %v1066_v55 = vpop.f32.mrf.mxu2  ;;  %v1214_v3 = vadd.f32 %v1106_v62, %v538_v29  ;;  %s1269_s10 = scalar_lea.hbm %s2789_s8, %s1884_s30  ;;  %s2177_s0 = scalar_lea.hbm %s2789_s8, 24 }
 0x115   : > { %v1080_v0 = vadd.f32 %v1079_v54, %v1066_v55  ;;  %s1273_s26 = sshll.u32 %s1269_s10, 4  ;;  %s1274_s26 = int_to_ptr.hbm [resolvable:$true] %s1273_s26 }
 0x116   : > { %v1107_v57 = vpop.f32.mrf.mxu1  ;;  %v1225_v10 = vrot.slane %v1214_v3, 6  ;;  %s2171_s30 = sshra.s32 %s1274_s26, 4  ;;  %s2172_s30 = int_to_ptr.hbm [resolvable:$true] %s2171_s30 }
 0x117   : > { %v1213_v7 = vadd.f32 %v1080_v0, %v537_v43  ;;  %s2173_s6 = scalar_lea.hbm %s2172_s30, 12  ;;  %p2178_p4 = scmp.lt.s32.totalorder %s2172_s30, %s2789_s8 }
 0x118   : > { %p2174_p0 = scmp.ne.s32.totalorder %s2172_s30, %s2173_s6  ;;  %p2179_p1 = scmp.lt.s32.totalorder %s2177_s0, %s2173_s6 }
 0x119   : > { %v1094_v56 = vpop.f32.mrf.mxu0  ;;  %v1229_v13 = vsel %vm553_vm5, %v1213_v7, %v1225_v10 }
 0x11a   : > { %p2175_p8 = pnand %p2174_p0, %p2330_p11  ;;  %p2180_p6 = por %p2179_p1, %p2178_p4 }
 0x11b   : > { %v1081_v58 = vpop.f32.mrf.mxu3 }
 0x11c   : > { %v1068_v59 = vpop.f32.mrf.mxu2  ;;  %p2176_p3 = pneg %p2175_p8 }
 0x11e   : > { %p2181_p13 = pnand %p2180_p6, %p2176_p3 }
 0x125   : > { %v1157_v60 = vpop.f32.mrf.mxu0 }
 0x128   : > { %v1144_v61 = vpop.f32.mrf.mxu1  ;;  %v1131_v1 = vpop.f32.mrf.mxu2 }
 0x129   : > { %v1158_v63 = vadd.f32 %v1157_v60, %v1144_v61 }
 0x12b   : > { %v1216_v4 = vadd.f32 %v1158_v63, %v540_v46 }
 0x12c   : > { %v1118_v2 = vpop.f32.mrf.mxu3 }
 0x12d   : > { %v1132_v5 = vadd.f32 %v1131_v1, %v1118_v2  ;;  %v1159_v6 = vpop.f32.mrf.mxu0  ;;  %v1227_v11 = vrot.slane %v1216_v4, 2 }
 0x12f   : > { %v1215_v8 = vadd.f32 %v1132_v5, %v539_v39 }
 0x130   : > { %v1146_v9 = vpop.f32.mrf.mxu1  ;;  %v1133_v15 = vpop.f32.mrf.mxu2 }
 0x131   : > { %v1226_v12 = vrot.slane %v1215_v8, 4 }
 0x133   : > { %v1230_v14 = vsel %vm555_vm6, %v1226_v12, %v1227_v11 }
 0x134   : > { %v1231_v16 = vsel %vm557_vm7, %v1229_v13, %v1230_v14  ;;  %v1120_v17 = vpop.f32.mrf.mxu3 }
 0x135   : > { %1235 = vst [vmem:[%s384_s15] sm:$0xff] %v1231_v16 }
 0x13c   : > { %v1209_v18 = vpop.f32.mrf.mxu1 }
 0x140   : > { %v1183_v19 = vpop.f32.mrf.mxu3 }
 0x143   : > { %v1196_v20 = vpop.f32.mrf.mxu0 }
 0x144   : > { %v1210_v21 = vadd.f32 %v1209_v18, %v1196_v20  ;;  %v1211_v24 = vpop.f32.mrf.mxu1 }
 0x146   : > { %v1218_v23 = vadd.f32 %v1210_v21, %v2679_v38 }
 0x148   : > { %v1170_v25 = vpop.f32.mrf.mxu2  ;;  %v1185_v28 = vpop.f32.mrf.mxu3  ;;  %v1228_v31 = vrot.slane %v1218_v23, 6 }
 0x149   : > { %v1184_v26 = vadd.f32 %v1183_v19, %v1170_v25 }
 0x14b   : > { %v1217_v30 = vadd.f32 %v1184_v26, %v2677_v37  ;;  %v1198_v32 = vpop.f32.mrf.mxu0 }
 0x14d   : > { %v1232_v33 = vsel %vm553_vm5, %v1217_v30, %v1228_v31 }
 0x14e   : > { %1236 = vst [vmem:[%s384_s15 + $0x8] sm:$0xf] %v1232_v33 }
 0x14f   : > { %2184 = shalt.err (!%p2181_p13)
}
 0x150   : > { %1908 = dma.vmem_to_hbm [thread:$0]  (%p2330_p11), %s1272_s23, 192, %s1274_s26, %s1243_s25   ;;  %v1172_v34 = vpop.f32.mrf.mxu2 }
 0x151 PF: > { %s2790_s7 = sld [smem:[#allocation18_spill]]  ;;  %p2792_p7 = scmp.ge.s32.totalorder %s2235_s24, 2 }
 0x153   : > { %p1929_p5 = pnand %p2792_p7, %p2334_p12 }
 0x155   : > { %p1930_p2 = pneg %p1929_p5 }
 0x157   : > { %s1285_s20 = sand.u32 1, %s2790_s7  }
 0x158   : > { %s1286_s17 = scalar_lea.sflag [#allocation4], %s1285_s20 }
 0x159   : > { %2214 = dma.done.wait (%p1930_p2), %s1286_s17, 192  }
 0x15a   : > { %2216 = vsyncadd (%p1930_p2), %s1286_s17, 4294967104  ;;  %s1296_s2 = scalar_lea.sflag [#allocation12], %s1285_s20 }
 0x15b   : > { %2218 = dma.done.wait (%p1930_p2), %s1296_s2, 192  }
 0x15c   : > { %2220 = vsyncadd (%p1930_p2), %s1296_s2, 4294967104  ;;  %s2793_s24 = sld [smem:[#allocation20_spill]]  ;;  %s2796_s21 = smov %s2227_s22 }
 0x15d   : > { %s2794_s29 = sld [smem:[#allocation19_spill]] }
 0x15e   : > { %s2795_s23 = sld [smem:[#allocation21_spill]] }
 0x162   : > { %p22_p11 = scmp.ge.s32.totalorder %s2793_s24, 4  }
 0x163   : > { %s2797_s22 = smov %s2794_s29 }
 0x164   :  { %24 = sbr.rel (!%p22_p11) target bundleno = 11 (0xb), region = 131 }
 0x169   :  { %1302 = vsyncpa [#allocation3], 1 }
 0x16a   :  { %1304 = vsyncpa [#allocation3 + $0x1], 1 }
 0x16b   :  { %1305 = vsyncpa [#allocation6], 1 }
 0x16c   :  { %1306 = vsyncpa [#allocation4], 1 }
 0x16d   :  { %1308 = vsyncpa [#allocation4 + $0x1], 1 }
 0x16e   :  { %1309 = vsyncpa [#allocation12], 1 }
 0x16f   :  { %1311 = vsyncpa [#allocation12 + $0x1], 1 }

</bundles_post_ra>
